<compile_context>
chip_gen: v6e
topology: v6e:2x2x1
jax: 0.10.0
libtpu: 0.0.40
codegen_flags: <defaults>
</compile_context>

<pallas_src>
import functools

import jax
import jax.numpy as jnp
from jax import lax
from jax.experimental import pallas as pl
from jax.experimental.pallas import tpu as pltpu


def _round_up(v: int, m: int) -> int:
    return ((v + m - 1) // m) * m


def _fc_relu_kernel(x_ref, w_ref, o_ref, acc_ref, *, use_bf16_mxu: bool):
    # x_ref: (tm, tk)  input tile
    # w_ref: (tn, tk)  weight tile in PyTorch [out, in] layout (no W.T in HBM)
    # o_ref: (tm, tn)  output tile
    # acc_ref: (tm, tn) f32 VMEM accumulator, resident across the K grid axis
    @pl.when(pl.program_id(2) == 0)
    def _init():
        acc_ref[...] = jnp.zeros_like(acc_ref)

    x = x_ref[...]
    w = w_ref[...]
    if use_bf16_mxu:
        # bf16 MXU inputs (v6e/v7x fast path); accumulate in f32.
        x = x.astype(jnp.bfloat16)
        w = w.astype(jnp.bfloat16)

    # Contract x's last dim against w's last dim: (tm,tk) x (tn,tk) -> (tm,tn).
    acc_ref[...] += lax.dot_general(
        x, w,
        dimension_numbers=(((1,), (1,)), ((), ())),
        preferred_element_type=jnp.float32,
    )

    @pl.when(pl.program_id(2) == pl.num_programs(2) - 1)
    def _finalize():
        # ReLU epilogue in f32, then cast to the output dtype.
        o_ref[...] = jnp.maximum(acc_ref[...], 0.0).astype(o_ref.dtype)


def fc_layer_forward(x, weight, *, tm=256, tn=512, tk=512, use_bf16_mxu=False):
    """FCLayer forward: relu(x @ weight.T).

    x:      [B, in_nodes]           (float32)
    weight: [out_nodes, in_nodes]   (PyTorch nn.Linear layout, float32)
    """
    B, K = x.shape
    N, Kw = weight.shape
    assert K == Kw, "weight in_nodes mismatch"

    # Clamp tiles to the (8,128)-aligned padded problem dims; keep N/K tiles
    # lane-dense (multiples of 128) and M tiles sublane-aligned (multiple of 8).
    tm = max(8, min(tm, _round_up(B, 8)))
    tn = max(128, min(tn, _round_up(N, 128)))
    tk = max(128, min(tk, _round_up(K, 128)))
    Mp = _round_up(B, tm)
    Np = _round_up(N, tn)
    Kp = _round_up(K, tk)

    # Zero padding is exact for matmul + ReLU (padded rows/cols sliced off below).
    xp = x if (Mp == B and Kp == K) else jnp.pad(x, ((0, Mp - B), (0, Kp - K)))
    wp = weight if (Np == N and Kp == K) else jnp.pad(weight, ((0, Np - N), (0, Kp - K)))

    grid = (Mp // tm, Np // tn, Kp // tk)

    itemsize = jnp.dtype(x.dtype).itemsize
    # One buffer set (double-buffered by the pipeline) + f32 accumulator scratch.
    buf_bytes = (tm * tk + tn * tk) * itemsize + tm * tn * (itemsize + 4)
    # Generous but v7x-safe (64 MiB physical per TC) scoped-VMEM limit.
    vmem_limit = int(min(max(4 * buf_bytes, 32 << 20), 48 << 20))

    cost = pl.CostEstimate(
        flops=2 * Mp * Kp * Np,
        transcendentals=0,
        bytes_accessed=(Mp * Kp + Np * Kp + Mp * Np) * itemsize,
    )

    kernel = functools.partial(_fc_relu_kernel, use_bf16_mxu=use_bf16_mxu)

    out_padded = pl.pallas_call(
        kernel,
        out_shape=jax.ShapeDtypeStruct((Mp, Np), x.dtype),
        grid_spec=pltpu.PrefetchScalarGridSpec(
            num_scalar_prefetch=0,
            grid=grid,
            in_specs=[
                pl.BlockSpec((tm, tk), lambda i, j, k: (i, k)),  # x tile
                pl.BlockSpec((tn, tk), lambda i, j, k: (j, k)),  # weight tile [out, in]
            ],
            out_specs=pl.BlockSpec((tm, tn), lambda i, j, k: (i, j)),
            scratch_shapes=[pltpu.VMEM((tm, tn), jnp.float32)],
        ),
        compiler_params=pltpu.CompilerParams(
            dimension_semantics=("parallel", "parallel", "arbitrary"),
            vmem_limit_bytes=vmem_limit,
        ),
        cost_estimate=cost,
    )(xp, wp)

    if Mp != B or Np != N:
        out_padded = out_padded[:B, :N]
    return out_padded


def init_fc_weight(key, in_nodes, out_nodes):
    # nn.init.kaiming_normal_(weight, nonlinearity="relu"):
    #   std = gain / sqrt(fan_in), gain(relu) = sqrt(2), fan_in = in_nodes
    gain = jnp.sqrt(2.0)
    std = gain / jnp.sqrt(jnp.float32(in_nodes))
    return jax.random.normal(key, (out_nodes, in_nodes), dtype=jnp.float32) * std


if __name__ == "__main__":
    key = jax.random.PRNGKey(0)
    k_x, k_w, k_x2, k_w2 = jax.random.split(key, 4)

    # Small shapes consistent with the module's default forward.
    batch, in_nodes, out_nodes = 8, 32, 64
    x = jax.random.normal(k_x, (batch, in_nodes), dtype=jnp.float32)
    weight = init_fc_weight(k_w, in_nodes, out_nodes)  # [out_nodes, in_nodes]

    out = jax.block_until_ready(fc_layer_forward(x, weight))
    ref = jnp.maximum(x @ weight.T, 0.0)
    assert out.shape == (batch, out_nodes)
    assert jnp.allclose(out, ref, atol=1e-4, rtol=1e-4), float(jnp.max(jnp.abs(out - ref)))

    # Larger shape to exercise the tiled grid / K-axis accumulator path.
    B2, K2, N2 = 256, 384, 512
    x2 = jax.random.normal(k_x2, (B2, K2), dtype=jnp.float32)
    w2 = init_fc_weight(k_w2, K2, N2)
    out2 = jax.block_until_ready(fc_layer_forward(x2, w2, tm=128, tn=256, tk=128))
    ref2 = jnp.maximum(x2 @ w2.T, 0.0)
    assert out2.shape == (B2, N2)
    assert jnp.allclose(out2, ref2, atol=1e-2, rtol=1e-2)

    # TODO(synk): optional normalisation / non-ReLU activations / dropout / bias
    # branches of FCLayer are not exercised by the default constructor and are omitted.
    print("KERNEL_OK")
</pallas_src>

<mosaic_0001>
module attributes {stable_mosaic.version = 11 : i64} {
  func.func @_fc_relu_kernel(%arg0: i32, %arg1: i32, %arg2: i32, %arg3: memref<8x128xf32, #tpu.memory_space<vmem>>, %arg4: memref<128x128xf32, #tpu.memory_space<vmem>>, %arg5: memref<8x128xf32, #tpu.memory_space<vmem>>, %arg6: memref<8x128xf32, #tpu.memory_space<vmem>>) attributes {dimension_semantics = [#tpu.dimension_semantics<parallel>, #tpu.dimension_semantics<parallel>, #tpu.dimension_semantics<arbitrary>], iteration_bounds = array<i64: 1, 1, 1>, scalar_prefetch = 0 : i64, scratch_operands = 1 : i64, tpu.core_type = #tpu.core_type<tc>, window_params = [{transform_indices = @transform_0, window_bounds = array<i64: 8, 128>}, {transform_indices = @transform_1, window_bounds = array<i64: 128, 128>}, {transform_indices = @transform_2, window_bounds = array<i64: 8, 128>}]} {
    %c0_i32 = arith.constant 0 : i32
    %0 = arith.cmpi eq, %arg2, %c0_i32 : i32
    %1 = arith.extui %0 : i1 to i32
    %c0_i32_0 = arith.constant 0 : i32
    %2 = arith.cmpi ne, %1, %c0_i32_0 : i32
    scf.if %2 {
      %cst_10 = arith.constant 0.000000e+00 : f32
      %12 = vector.broadcast %cst_10 : f32 to vector<8x128xf32>
      %c0_11 = arith.constant 0 : index
      %c0_12 = arith.constant 0 : index
      %13 = vector.load %arg6[%c0_11, %c0_12] : memref<8x128xf32, #tpu.memory_space<vmem>>, vector<8x128xf32>
      tpu.vector_store %arg6[%c0_11, %c0_12], %12 {strides = array<i32>} : memref<8x128xf32, #tpu.memory_space<vmem>>, vector<8x128xf32>,
    } else {
    }
    %c0 = arith.constant 0 : index
    %c0_1 = arith.constant 0 : index
    %3 = vector.load %arg3[%c0, %c0_1] : memref<8x128xf32, #tpu.memory_space<vmem>>, vector<8x128xf32>
    %c0_2 = arith.constant 0 : index
    %c0_3 = arith.constant 0 : index
    %4 = vector.load %arg4[%c0_2, %c0_3] : memref<128x128xf32, #tpu.memory_space<vmem>>, vector<128x128xf32>
    %c0_4 = arith.constant 0 : index
    %c0_5 = arith.constant 0 : index
    %5 = vector.load %arg6[%c0_4, %c0_5] : memref<8x128xf32, #tpu.memory_space<vmem>>, vector<8x128xf32>
    %cst = arith.constant dense<0.000000e+00> : vector<8x128xf32>
    %6 = tpu.matmul %3, %4, %cst {dimension_numbers = #tpu.dot_dimension_numbers<[1], [1], [0], [0], [0, 0, 1, 0], [], []>} : vector<8x128xf32>, vector<128x128xf32>, vector<8x128xf32> -> vector<8x128xf32>
    %7 = arith.addf %5, %6 : vector<8x128xf32>
    %c0_6 = arith.constant 0 : index
    %c0_7 = arith.constant 0 : index
    %8 = vector.load %arg6[%c0_6, %c0_7] : memref<8x128xf32, #tpu.memory_space<vmem>>, vector<8x128xf32>
    tpu.vector_store %arg6[%c0_6, %c0_7], %7 {strides = array<i32>} : memref<8x128xf32, #tpu.memory_space<vmem>>, vector<8x128xf32>,
    %c0_i32_8 = arith.constant 0 : i32
    %9 = arith.cmpi eq, %arg2, %c0_i32_8 : i32
    %10 = arith.extui %9 : i1 to i32
    %c0_i32_9 = arith.constant 0 : i32
    %11 = arith.cmpi ne, %10, %c0_i32_9 : i32
    scf.if %11 {
      %c0_10 = arith.constant 0 : index
      %c0_11 = arith.constant 0 : index
      %12 = vector.load %arg6[%c0_10, %c0_11] : memref<8x128xf32, #tpu.memory_space<vmem>>, vector<8x128xf32>
      %cst_12 = arith.constant 0.000000e+00 : f32
      %13 = vector.broadcast %cst_12 : f32 to vector<8x128xf32>
      %14 = arith.maximumf %12, %13 : vector<8x128xf32>
      %c0_13 = arith.constant 0 : index
      %c0_14 = arith.constant 0 : index
      %15 = vector.load %arg5[%c0_13, %c0_14] : memref<8x128xf32, #tpu.memory_space<vmem>>, vector<8x128xf32>
      tpu.vector_store %arg5[%c0_13, %c0_14], %14 {strides = array<i32>} : memref<8x128xf32, #tpu.memory_space<vmem>>, vector<8x128xf32>,
    } else {
    }
    return
  }
  func.func @transform_0(%arg0: i32, %arg1: i32, %arg2: i32) -> (i32, i32) {
    %c0_i32 = arith.constant 0 : i32
    return %arg0, %arg2 : i32, i32
  }
  func.func @transform_1(%arg0: i32, %arg1: i32, %arg2: i32) -> (i32, i32) {
    %c0_i32 = arith.constant 0 : i32
    return %arg1, %arg2 : i32, i32
  }
  func.func @transform_2(%arg0: i32, %arg1: i32, %arg2: i32) -> (i32, i32) {
    %c0_i32 = arith.constant 0 : i32
    return %arg0, %arg1 : i32, i32
  }
}

</mosaic_0001>

<bundles_post_ra>
// kernel: tpu_custom_call.1
= control target key start
LH: loop header
LB: loop body
LE: loop exit
PB: predicated region body
PF: predicated region fallthrough
CT: control target
= control target key end

     0   :  { %7 = vsyncpa [#allocation4], 0  ;;  %s311_s0 = inlined_call_operand.hbm [shape: f32[8,128], index: 0, kind: input, shape index: {}]   ;;  %s312_s1 = inlined_call_operand.hbm [shape: f32[128,128], index: 1, kind: input, shape index: {}]   ;;  %s313_s2 = inlined_call_operand.hbm [shape: f32[8,128], index: 2, kind: output, shape index: {}]  }
   0x1   :  { %8 = vsyncpa [#allocation7], 0 }
   0x2   :  { %9 = vsyncpa [#allocation5], 0  ;;  %s280_s9 = smov [#allocation3]   ;;  %s281_s11 = smov [#allocation6]  }
   0x3   :  { %s16_s10 = sshll.u32 %s280_s9, 4  ;;  %s25_s12 = sshll.u32 %s281_s11, 4  ;;  %s17_s10 = int_to_ptr.vmem [resolvable:$true] %s16_s10  ;;  %s26_s12 = int_to_ptr.vmem [resolvable:$true] %s25_s12 }
   0x4   :  { %s222_s13 = scalar_lea.vmem %s17_s10, 128  ;;  %p227_p1 = scmp.lt.s32.totalorder %s17_s10, %s17_s10 }
   0x5   :  { %p223_p0 = scmp.ne.s32.totalorder %s17_s10, %s222_s13  ;;  %p228_p2 = scmp.lt.s32.totalorder %s222_s13, %s222_s13 }
   0x7   :  { %p229_p3 = por %p228_p2, %p227_p1 }
   0x9   :  { %p230_p4 = pnand %p229_p3, %p223_p0 }
   0xb   :  { %233 = shalt.err (!%p230_p4)
}
   0xc   :  { %19 = dma.hbm_to_vmem [thread:$0]  %s311_s0, 128, %s17_s10, [#allocation4]  }
   0xd   :  { %s242_s16 = scalar_lea.vmem %s26_s12, 2048  ;;  %p247_p6 = scmp.lt.s32.totalorder %s26_s12, %s26_s12 }
   0xe   :  { %p243_p5 = scmp.ne.s32.totalorder %s26_s12, %s242_s16  ;;  %p248_p7 = scmp.lt.s32.totalorder %s242_s16, %s242_s16 }
  0x10   :  { %p249_p8 = por %p248_p7, %p247_p6 }
  0x12   :  { %p250_p9 = pnand %p249_p8, %p243_p5 }
  0x14   :  { %253 = shalt.err (!%p250_p9)
}
  0x15   :  { %s282_s17 = smov 128   ;;  %s283_s18 = smov 8  }
  0x16   :  { %31 = dma.hbm_to_vmem [thread:$0]  %s312_s1, 2048, %s26_s12, [#allocation7], %s282_s17, %s282_s17, %s283_s18  }
  0x17   :  { %274 = dma.done.wait [#allocation4], 128  }
  0x18   :  { %275 = vsyncadd [#allocation4], 4294967168 }
  0x19   :  { %276 = dma.done.wait [#allocation7], 2048  }
  0x1a   :  { %277 = vsyncadd [#allocation7], 4294965248  ;;  %v284_v0 = vmov 0.0   ;;  %vm285_vm0 = vmmov 0   ;;  %v59_v1 = vld [vmem:[#allocation6 + $0x78] sm:$0xff]  ;;  %v58_v2 = vld [vmem:[#allocation6 + $0x70] sm:$0xff] }
  0x1b   :  { %172 = vmatprep.subr.mxu0 %v284_v0  ;;  %204 = vmatprep.mubr.msk.f32.mxu0 %vm285_vm0, %v284_v0  ;;  %v57_v3 = vld [vmem:[#allocation6 + $0x68] sm:$0xff]  ;;  %v56_v4 = vld [vmem:[#allocation6 + $0x60] sm:$0xff]  ;;  %v55_v5 = vld [vmem:[#allocation6 + $0x58] sm:$0xff]  ;;  %s286_s0 = smov [#allocation8]  }
  0x1c   :  { %173 = vmatpush3.xpose.msra.mxu0 %v59_v1  ;;  %v54_v6 = vld [vmem:[#allocation6 + $0x50] sm:$0xff]  ;;  %v53_v7 = vld [vmem:[#allocation6 + $0x48] sm:$0xff]  ;;  %v52_v8 = vld [vmem:[#allocation6 + $0x40] sm:$0xff]  ;;  %s145_s1 = sshll.u32 %s286_s0, 4  ;;  %s146_s1 = int_to_ptr.vmem [resolvable:$true] %s145_s1 }
  0x1d   :  { %174 = vmatprep.subr.mxu0 %v284_v0  ;;  %v51_v9 = vld [vmem:[#allocation6 + $0x38] sm:$0xff]  ;;  %v50_v10 = vld [vmem:[#allocation6 + $0x30] sm:$0xff]  ;;  %v49_v11 = vld [vmem:[#allocation6 + $0x28] sm:$0xff]  ;;  %s254_s21 = scalar_lea.vmem %s146_s1, 128  ;;  %p259_p11 = scmp.lt.s32.totalorder %s146_s1, %s146_s1 }
  0x1e   :  { %v48_v12 = vld [vmem:[#allocation6 + $0x20] sm:$0xff]  ;;  %v47_v13 = vld [vmem:[#allocation6 + $0x18] sm:$0xff]  ;;  %v46_v14 = vld [vmem:[#allocation6 + $0x10] sm:$0xff]  ;;  %p255_p10 = scmp.ne.s32.totalorder %s146_s1, %s254_s21  ;;  %p260_p12 = scmp.lt.s32.totalorder %s254_s21, %s254_s21 }
  0x1f   :  { %v45_v15 = vld [vmem:[#allocation6 + $0x8] sm:$0xff]  ;;  %v44_v16 = vld [vmem:[#allocation6] sm:$0xff]  ;;  %v43_v17 = vld [vmem:[#allocation3] sm:$0xff] }
  0x20   :  { %175 = vmatpush3.xpose.msra.mxu0 %v58_v2  ;;  %p261_p13 = por %p260_p12, %p259_p11 }
  0x21   :  { %176 = vmatprep.subr.mxu0 %v284_v0 }
  0x22   :  { %p262_p0 = pnand %p261_p13, %p255_p10 }
  0x24   :  { %177 = vmatpush3.xpose.msra.mxu0 %v57_v3 }
  0x25   :  { %178 = vmatprep.subr.mxu0 %v284_v0 }
  0x28   :  { %179 = vmatpush3.xpose.msra.mxu0 %v56_v4 }
  0x29   :  { %180 = vmatprep.subr.mxu0 %v284_v0 }
  0x2c   :  { %181 = vmatpush3.xpose.msra.mxu0 %v55_v5 }
  0x2d   :  { %182 = vmatprep.subr.mxu0 %v284_v0 }
  0x30   :  { %183 = vmatpush3.xpose.msra.mxu0 %v54_v6 }
  0x31   :  { %184 = vmatprep.subr.mxu0 %v284_v0 }
  0x34   :  { %185 = vmatpush3.xpose.msra.mxu0 %v53_v7 }
  0x35   :  { %186 = vmatprep.subr.mxu0 %v284_v0 }
  0x38   :  { %187 = vmatpush3.xpose.msra.mxu0 %v52_v8 }
  0x39   :  { %188 = vmatprep.subr.mxu0 %v284_v0 }
  0x3c   :  { %189 = vmatpush3.xpose.msra.mxu0 %v51_v9 }
  0x3d   :  { %190 = vmatprep.subr.mxu0 %v284_v0 }
  0x40   :  { %191 = vmatpush3.xpose.msra.mxu0 %v50_v10 }
  0x41   :  { %192 = vmatprep.subr.mxu0 %v284_v0 }
  0x44   :  { %193 = vmatpush3.xpose.msra.mxu0 %v49_v11 }
  0x45   :  { %194 = vmatprep.subr.mxu0 %v284_v0 }
  0x48   :  { %195 = vmatpush3.xpose.msra.mxu0 %v48_v12 }
  0x49   :  { %196 = vmatprep.subr.mxu0 %v284_v0 }
  0x4c   :  { %197 = vmatpush3.xpose.msra.mxu0 %v47_v13 }
  0x4d   :  { %198 = vmatprep.subr.mxu0 %v284_v0 }
  0x50   :  { %199 = vmatpush3.xpose.msra.mxu0 %v46_v14 }
  0x51   :  { %200 = vmatprep.subr.mxu0 %v284_v0 }
  0x54   :  { %201 = vmatpush3.xpose.msra.mxu0 %v45_v15 }
  0x55   :  { %202 = vmatprep.subr.mxu0 %v284_v0 }
  0x58   :  { %203 = vmatpush3.xpose.msra.mxu0 %v44_v16 }
  0x5b   :  { %205 = vmatmul.mubr.f32.vlgmr.msra.gmra.mxu0 %v43_v17 }
 0x11b   :  { %v127_v18 = vpop.f32.mrf.mxu0 }
 0x11c   :  { %v137_v19 = vmax.f32 %v127_v18, 0.0 }
 0x11d   :  { %v206_v20 = vpop.f32.mrf.mxu0 }
 0x11e   :  { %138 = vst [vmem:[#allocation8] sm:$0xff] %v137_v19 }
 0x11f   :  { %265 = shalt.err (!%p262_p0)
}
 0x120   :  { %148 = dma.vmem_to_hbm [thread:$0]  %s146_s1, 128, %s313_s2, [#allocation5]  }
 0x121   :  { %278 = dma.done.wait [#allocation5], 128  }
 0x122   :  { %279 = vsyncadd [#allocation5], 4294967168 }
 0x123   :  { %152 = vsyncpa [#allocation4], 1 }
 0x124   :  { %153 = vsyncpa [#allocation7], 1 }
 0x125   :  { %154 = vsyncpa [#allocation5], 1 }

</bundles_post_ra>
